<compile_context>
chip_gen: v6e
topology: v6e:2x2x1
jax: 0.10.0
libtpu: 0.0.40
codegen_flags: <defaults>
</compile_context>

<pallas_src>
import functools

import jax
import jax.numpy as jnp
from jax import lax
from jax.experimental import pallas as pl
from jax.experimental.pallas import tpu as pltpu


_ACTION_HIDDEN_SENTINEL = 1 << 30   # pushes hidden action dims past any thr


# ---------------------------------------------------------------------------
# Kernels
# ---------------------------------------------------------------------------

def _static_mask_kernel(row_ref, out_ref, *, to_bool):
    """fix_obs_steps=True: pure sublane-broadcast store of a 1-byte template."""
    block = jnp.broadcast_to(row_ref[...], out_ref.shape)        # int8 (Bblk, W)
    out_ref[...] = (block != 0) if to_bool else block


def _dynamic_mask_kernel(thr_ref, tmpl_ref, out_ref, *, to_bool):
    """fix_obs_steps=False: single compare against a per-row threshold.

    tmpl_ref: (1, W) int32, tmpl[t*D+d] = t*D + d + offset(d)
    thr_ref : (Bblk, 1) int32, thr = obs_steps * D
    """
    mask = tmpl_ref[...] < thr_ref[...]                           # (Bblk, W) bool
    out_ref[...] = mask if to_bool else mask.astype(out_ref.dtype)


# ---------------------------------------------------------------------------
# Helpers
# ---------------------------------------------------------------------------

@functools.cache
def _bool_output_supported():
    """Probe (once, compile-only -- no kernel execution) for bool outputs."""
    def probe(o_ref):
        o_ref[...] = lax.broadcasted_iota(jnp.int32, o_ref.shape, 1) < 5

    try:
        fn = pl.pallas_call(
            probe, out_shape=jax.ShapeDtypeStruct((32, 128), jnp.bool_))
        jax.jit(fn).lower().compile()     # AOT lower + compile, never run
        return True
    except Exception:                     # fall back to int8 output + one cast
        return False


@functools.cache
def _tensorcores_per_chip():
    """Heuristic: v7x exposes 2 TensorCores per chip; v5e/v6e have 1."""
    try:
        kind = jax.devices()[0].device_kind.lower()
    except Exception:
        return 1
    return 2 if "v7" in kind else 1


def _pick_batch_block(B, width, itemsize):
    """Rows of the flattened (B, T*D) output written per grid step."""
    # ~4 MiB blocks (double-buffered -> ~8 MiB) sit well under the scoped-VMEM
    # defaults of v5e (16 MiB), v6e/v7x (32 MiB) and already reach the HBM
    # writeback roofline; bigger only adds VMEM pressure.
    target_bytes = 4 * 1024 * 1024
    cap = max(32, (target_bytes // max(width * itemsize, 1)) // 32 * 32)
    # Single grid step on 1-TC chips (serial loop, steps are pure overhead);
    # an even 2-way split on 2-TC chips so ("parallel",) uses both cores.
    steps = 2 if (_tensorcores_per_chip() >= 2 and B > 32) else 1
    rows = min(-(-B // steps), cap)
    if rows >= B:
        return B                          # single full-extent block
    return max(32, (rows // 32) * 32)     # 1-byte sublane-tile aligned


def _sample_obs_steps(B, max_n_obs_steps, seed):
    key = jax.random.PRNGKey(0 if seed is None else seed)
    return jax.random.randint(key, (B,), 1, max_n_obs_steps + 1,
                              dtype=jnp.int32)


def _static_row_template(T, D, action_dim, obs_steps, action_visible):
    """Batch-invariant (1, T*D) int8 mask row, computed once in the wrapper."""
    t_idx = jnp.arange(T, dtype=jnp.int32)[:, None]
    d_idx = jnp.arange(D, dtype=jnp.int32)[None, :]
    is_action = d_idx < action_dim
    row = (t_idx < obs_steps) & jnp.logical_not(is_action)
    if action_visible:
        act_steps = max(int(obs_steps) - 1, 0)
        row = row | ((t_idx < act_steps) & is_action)
    return row.reshape(1, T * D).astype(jnp.int8)


def _dynamic_template(T, D, action_dim, action_visible):
    """(1, T*D) int32 template: flat position plus per-feature offset."""
    pos = jnp.arange(T * D, dtype=jnp.int32)
    d_idx = pos % D
    off = jnp.where(
        d_idx < action_dim,
        jnp.int32(D if action_visible else _ACTION_HIDDEN_SENTINEL),
        jnp.int32(0))
    return (pos + off).reshape(1, T * D)


# ---------------------------------------------------------------------------
# Public wrapper (JAX/Pallas equivalent of LowdimMaskGenerator.forward)
# ---------------------------------------------------------------------------

def lowdim_mask_generator(trajectory, *, action_dim, obs_dim,
                          max_n_obs_steps=2, fix_obs_steps=True,
                          action_visible=False, seed=None):
    B, T, D = trajectory.shape
    assert D == action_dim + obs_dim

    width = T * D
    out_dtype = jnp.bool_ if _bool_output_supported() else jnp.int8
    to_bool = out_dtype == jnp.bool_
    b_blk = _pick_batch_block(B, width, 1)
    grid = (pl.cdiv(B, b_blk),)

    out_shape = jax.ShapeDtypeStruct((B, width), out_dtype)
    out_spec = pl.BlockSpec((b_blk, width), lambda i: (i, 0))
    tmpl_spec = pl.BlockSpec((1, width), lambda i: (0, 0))
    cparams = pltpu.CompilerParams(dimension_semantics=("parallel",))

    # TODO(synk): if T*D is not a multiple of 128 lanes the trailing chunk of
    # each row uses masked stores; a fully lane-dense (B*T*D)-flat re-blocking
    # (possible for the static path) is not implemented here.

    if fix_obs_steps:
        row = _static_row_template(T, D, action_dim, int(max_n_obs_steps),
                                   action_visible)
        kernel = functools.partial(_static_mask_kernel, to_bool=to_bool)
        flat_mask = pl.pallas_call(
            kernel, out_shape=out_shape, grid=grid,
            in_specs=[tmpl_spec], out_specs=out_spec,
            compiler_params=cparams)(row)
    else:
        # TODO(synk): torch.Generator's RNG stream has no JAX equivalent; use
        # jax.random with the given seed (seed=None falls back to key 0, so
        # repeated seedless calls repeat the same draw, unlike torch).
        obs_steps = _sample_obs_steps(B, max_n_obs_steps, seed)
        thr = (obs_steps.astype(jnp.int32) * D).reshape(B, 1)     # obs * D
        tmpl = _dynamic_template(T, D, action_dim, action_visible)
        kernel = functools.partial(_dynamic_mask_kernel, to_bool=to_bool)
        flat_mask = pl.pallas_call(
            kernel, out_shape=out_shape, grid=grid,
            in_specs=[pl.BlockSpec((b_blk, 1), lambda i: (i, 0)), tmpl_spec],
            out_specs=out_spec,
            compiler_params=cparams)(thr, tmpl)

    mask = flat_mask.reshape(B, T, D)
    if mask.dtype != jnp.bool_:
        mask = mask != 0      # int8-fallback only; the bool path skips this
    return mask


# ---------------------------------------------------------------------------
# Pure-JAX reference + self-test
# ---------------------------------------------------------------------------

def _reference_mask(B, T, D, obs_steps, *, action_dim, action_visible):
    d_idx = jnp.arange(D)
    is_action_dim = (d_idx < action_dim)[None, None, :]
    steps = jnp.arange(T)[None, :, None]
    obs = obs_steps.astype(jnp.int32)[:, None, None]
    mask = (steps < obs) & (~is_action_dim)
    if action_visible:
        act = jnp.maximum(obs - 1, 0)
        mask = mask | ((steps < act) & is_action_dim)
    return jnp.broadcast_to(mask, (B, T, D))


if __name__ == "__main__":
    key = jax.random.PRNGKey(0)
    ok = True

    # Config A: tiny batch, fixed obs steps (the module's default path).
    B, T, action_dim, obs_dim = 2, 8, 4, 12
    D = action_dim + obs_dim                      # 16 -> T*D = 128 lanes
    traj = jax.random.normal(key, (B, T, D), dtype=jnp.float32)
    for action_visible in (False, True):
        mask = lowdim_mask_generator(
            traj, action_dim=action_dim, obs_dim=obs_dim, max_n_obs_steps=2,
            fix_obs_steps=True, action_visible=action_visible)
        mask = jax.block_until_ready(mask)
        ref = _reference_mask(
            B, T, D, jnp.full((B,), 2, jnp.int32),
            action_dim=action_dim, action_visible=action_visible)
        ok &= (mask.shape == (B, T, D)) and (mask.dtype == jnp.bool_)
        ok &= bool(jnp.array_equal(mask, ref))

    # Config B: larger batch, random per-row obs steps (dynamic kernel).
    B2 = 40
    traj2 = jax.random.normal(key, (B2, T, D), dtype=jnp.float32)
    for action_visible in (False, True):
        mask = lowdim_mask_generator(
            traj2, action_dim=action_dim, obs_dim=obs_dim, max_n_obs_steps=3,
            fix_obs_steps=False, action_visible=action_visible, seed=7)
        mask = jax.block_until_ready(mask)
        ref = _reference_mask(
            B2, T, D, _sample_obs_steps(B2, 3, 7),
            action_dim=action_dim, action_visible=action_visible)
        ok &= (mask.shape == (B2, T, D)) and (mask.dtype == jnp.bool_)
        ok &= bool(jnp.array_equal(mask, ref))

    print("KERNEL_OK" if ok else "MISMATCH")
</pallas_src>

<mosaic_0001>
module attributes {stable_mosaic.version = 11 : i64} {
  func.func @_static_mask_kernel(%arg0: i32, %arg1: memref<1x128xi8, #tpu.memory_space<vmem>>, %arg2: memref<2x128xi8, #tpu.memory_space<vmem>>) attributes {dimension_semantics = [#tpu.dimension_semantics<parallel>], iteration_bounds = array<i64: 1>, scalar_prefetch = 0 : i64, scratch_operands = 0 : i64, tpu.core_type = #tpu.core_type<tc>, window_params = [{pipeline_mode = #tpu.pipeline_mode<synchronous>, transform_indices = @transform_0, window_bounds = array<i64: 1, 128>}, {transform_indices = @transform_1, window_bounds = array<i64: 2, 128>}]} {
    %c0 = arith.constant 0 : index
    %c0_0 = arith.constant 0 : index
    %0 = vector.load %arg1[%c0, %c0_0] : memref<1x128xi8, #tpu.memory_space<vmem>>, vector<1x128xi8>
    %1 = vector.shape_cast %0 : vector<1x128xi8> to vector<1x128xi8>
    %2 = vector.broadcast %1 : vector<1x128xi8> to vector<2x128xi8>
    %c0_1 = arith.constant 0 : index
    %c0_2 = arith.constant 0 : index
    %3 = vector.load %arg2[%c0_1, %c0_2] : memref<2x128xi8, #tpu.memory_space<vmem>>, vector<2x128xi8>
    tpu.vector_store %arg2[%c0_1, %c0_2], %2 {strides = array<i32>} : memref<2x128xi8, #tpu.memory_space<vmem>>, vector<2x128xi8>,
    return
  }
  func.func @transform_0(%arg0: i32) -> (i32, i32) {
    %c0_i32 = arith.constant 0 : i32
    %c0_i32_0 = arith.constant 0 : i32
    %c0_i32_1 = arith.constant 0 : i32
    return %c0_i32, %c0_i32_0 : i32, i32
  }
  func.func @transform_1(%arg0: i32) -> (i32, i32) {
    %c0_i32 = arith.constant 0 : i32
    %c0_i32_0 = arith.constant 0 : i32
    return %arg0, %c0_i32 : i32, i32
  }
}

</mosaic_0001>

<bundles_post_ra>
// kernel: tpu_custom_call.1
= control target key start
LH: loop header
LB: loop body
LE: loop exit
PB: predicated region body
PF: predicated region fallthrough
CT: control target
= control target key end

     0   :  { %6 = vsyncpa [#allocation3], 0  ;;  %s114_s0 = inlined_call_operand.hbm [shape: s8[1,128], index: 0, kind: input, shape index: {}]   ;;  %s115_s1 = inlined_call_operand.hbm [shape: s8[2,128], index: 1, kind: output, shape index: {}]  }
   0x1   :  { %7 = vsyncpa [#allocation4], 0  ;;  %s96_s6 = smov [#allocation2]  }
   0x2   :  { %s14_s7 = sshll.u32 %s96_s6, 4  ;;  %s15_s7 = int_to_ptr.vmem [resolvable:$true] %s14_s7 }
   0x3   :  { %s60_s8 = scalar_lea.vmem %s15_s7, 16  ;;  %s64_s9 = scalar_lea.vmem %s15_s7, 32 }
   0x4   :  { %p61_p0 = scmp.ne.s32.totalorder %s15_s7, %s60_s8  ;;  %p65_p1 = scmp.lt.s32.totalorder %s15_s7, %s15_s7 }
   0x5   :  { %p66_p2 = scmp.lt.s32.totalorder %s64_s9, %s60_s8 }
   0x7   :  { %p67_p3 = por %p66_p2, %p65_p1 }
   0x9   :  { %p68_p4 = pnand %p67_p3, %p61_p0 }
   0xb   :  { %71 = shalt.err (!%p68_p4)
}
   0xc   :  { %17 = dma.hbm_to_vmem [thread:$0]  %s114_s0, 16, %s15_s7, [#allocation3]  }
   0xd   :  { %92 = dma.done.wait [#allocation3], 16  }
   0xe   :  { %93 = vsyncadd [#allocation3], 4294967280  ;;  %v25_v0 = vlaneseq  ;;  %v21_v2 = vld [vmem:[#allocation2] sm:$0x1]  ;;  %vm29_vm0 = vcmask 1040384   ;;  %s97_s12 = smov [#allocation5]  }
   0xf   :  { %v23_v3 = vpack.i.b16 %v21_v2, %v21_v2  ;;  %vm30_vm1 = vsmask.f32 256  ;;  %s41_s13 = sshll.u32 %s97_s12, 4  ;;  %v32_v6 = vld [vmem:[#allocation5] sm:$0x1]  ;;  %s42_s13 = int_to_ptr.vmem [resolvable:$true] %s41_s13 }
  0x10   :  { %v26_v1 = vshrl.u32 %v25_v0, 7  ;;  %vm31_vm2 = vmand %vm29_vm0, %vm30_vm1  ;;  %s72_s14 = scalar_lea.vmem %s42_s13, 16  ;;  %s76_s0 = scalar_lea.vmem %s42_s13, 32 }
  0x11   :  { %v24_v5 = vpack.i.b8 %v23_v3, %v23_v3  ;;  %p73_p5 = scmp.ne.s32.totalorder %s42_s13, %s72_s14  ;;  %p77_p6 = scmp.lt.s32.totalorder %s42_s13, %s42_s13 }
  0x12   :  { %v27_v4 = vsub.s32 0, %v26_v1  ;;  %p78_p7 = scmp.lt.s32.totalorder %s76_s0, %s72_s14 }
  0x14   :  { %v28_v7 = vrot.slane %v24_v5, %v27_v4  ;;  %p79_p8 = por %p78_p7, %p77_p6 }
  0x16   :  { %v33_v8 = vsel %vm31_vm2, %v28_v7, %v32_v6  ;;  %p80_p9 = pnand %p79_p8, %p73_p5 }
  0x17   :  { %34 = vst [vmem:[#allocation5] sm:$0x1] %v33_v8 }
  0x18   :  { %83 = shalt.err (!%p80_p9)
}
  0x19   :  { %44 = dma.vmem_to_hbm [thread:$0]  %s42_s13, 16, %s115_s1, [#allocation4]  }
  0x1a   :  { %94 = dma.done.wait [#allocation4], 16  }
  0x1b   :  { %95 = vsyncadd [#allocation4], 4294967280 }
  0x1c   :  { %48 = vsyncpa [#allocation3], 1 }
  0x1d   :  { %49 = vsyncpa [#allocation4], 1 }

</bundles_post_ra>
